<compile_context>
chip_gen: v7x
topology: tpu7x:2x2x1
jax: 0.10.0
libtpu: 0.0.40
codegen_flags: <defaults>
</compile_context>

<pallas_src>
import jax
import jax.numpy as jnp
from jax.experimental import pallas as pl
from jax.experimental.pallas import tpu as pltpu


def _round_up(v: int, m: int) -> int:
    return ((v + m - 1) // m) * m


def _linear_kernel(x_ref, w_ref, b_ref, o_ref, acc_ref):
    """Computes one (tm, tn) output tile; grid axis 2 walks the K reduction."""
    k = pl.program_id(2)

    @pl.when(k == 0)
    def _init():
        acc_ref[...] = jnp.zeros_like(acc_ref)

    # MXU matmul: (tm, tk) @ (tk, tn), bf16 inputs, f32 accumulation.
    acc_ref[...] += jnp.dot(
        x_ref[...], w_ref[...], preferred_element_type=jnp.float32
    )

    @pl.when(k == pl.num_programs(2) - 1)
    def _finalize():
        # Bias added exactly once (after the K loop), then cast at the store.
        o_ref[...] = (acc_ref[...] + b_ref[...].astype(jnp.float32)).astype(
            o_ref.dtype
        )


def net_forward(
    x,
    weight,
    bias,
    *,
    tm: int = 256,
    tn: int = 256,
    tk: int = 512,
    compute_dtype=jnp.bfloat16,
):
    """Pallas equivalent of Net.forward (a single Linear layer).

    x: (B, Din) float32, weight: (Dout, Din), bias: (Dout,).
    Returns (B, Dout) in x.dtype.
    """
    B, Din = x.shape
    Dout, _ = weight.shape
    out_dtype = x.dtype

    # Clamp tiles to the (aligned) problem size so small problems stay small.
    tm = min(tm, _round_up(B, 8))        # sublane-aligned
    tk = min(tk, _round_up(Din, 128))    # lane-aligned
    tn = min(tn, _round_up(Dout, 128))   # lane-dense output

    Mp = _round_up(B, tm)
    Kp = _round_up(Din, tk)
    Np = _round_up(Dout, tn)

    # Wrapper-side prep (plain XLA, done once): transpose weight, pad, cast.
    w_t = jnp.transpose(weight)                                   # (Din, Dout)
    x_p = jnp.pad(x, ((0, Mp - B), (0, Kp - Din))).astype(compute_dtype)
    w_p = jnp.pad(w_t, ((0, Kp - Din), (0, Np - Dout))).astype(compute_dtype)
    b_p = jnp.pad(bias.reshape(1, Dout), ((0, 0), (0, Np - Dout))).astype(
        jnp.float32
    )

    grid = (Mp // tm, Np // tn, Kp // tk)

    out_padded = pl.pallas_call(
        _linear_kernel,
        out_shape=jax.ShapeDtypeStruct((Mp, Np), out_dtype),
        grid=grid,
        in_specs=[
            pl.BlockSpec((tm, tk), lambda i, j, k: (i, k)),   # x tile
            pl.BlockSpec((tk, tn), lambda i, j, k: (k, j)),   # w tile (pre-T)
            pl.BlockSpec((1, tn), lambda i, j, k: (0, j)),    # bias slice
        ],
        out_specs=pl.BlockSpec((tm, tn), lambda i, j, k: (i, j)),
        scratch_shapes=[pltpu.VMEM((tm, tn), jnp.float32)],
        compiler_params=pltpu.CompilerParams(
            dimension_semantics=("parallel", "parallel", "arbitrary"),
        ),
    )(x_p, w_p, b_p)

    return out_padded[:B, :Dout]


if __name__ == "__main__":
    # Iris-style dims: 4 input features, 3 output classes; small batch.
    dim_input, dim_output = 4, 3
    batch = 8

    # Deterministic parameter init matching the PyTorch module's __init__.
    weight = jnp.ones((dim_output, dim_input), dtype=jnp.float32)
    bias = jnp.ones((dim_output,), dtype=jnp.float32)

    # Deterministic example input.
    key = jax.random.PRNGKey(0)
    x = jax.random.normal(key, (batch, dim_input), dtype=jnp.float32)

    fwd = jax.jit(net_forward)
    out = jax.block_until_ready(fwd(x, weight, bias))

    # Reference applying the same bf16 input rounding the kernel uses on the
    # MXU (f32 accumulation), so the comparison is apples-to-apples.
    x_bf = x.astype(jnp.bfloat16).astype(jnp.float32)
    w_bf = weight.astype(jnp.bfloat16).astype(jnp.float32)
    ref = x_bf @ w_bf.T + bias

    assert out.shape == (batch, dim_output)
    assert out.dtype == x.dtype
    assert jnp.allclose(out, ref, atol=1e-3, rtol=1e-3), "mismatch vs reference"

    print("KERNEL_OK")
</pallas_src>

<mosaic_0001>
module attributes {stable_mosaic.version = 11 : i64} {
  func.func @_linear_kernel(%arg0: i32, %arg1: i32, %arg2: i32, %arg3: memref<8x128xbf16, #tpu.memory_space<vmem>>, %arg4: memref<128x128xbf16, #tpu.memory_space<vmem>>, %arg5: memref<1x128xf32, #tpu.memory_space<vmem>>, %arg6: memref<8x128xf32, #tpu.memory_space<vmem>>, %arg7: memref<8x128xf32, #tpu.memory_space<vmem>>) attributes {dimension_semantics = [#tpu.dimension_semantics<parallel>, #tpu.dimension_semantics<parallel>, #tpu.dimension_semantics<arbitrary>], iteration_bounds = array<i64: 1, 1, 1>, scalar_prefetch = 0 : i64, scratch_operands = 1 : i64, tpu.core_type = #tpu.core_type<tc>, window_params = [{transform_indices = @transform_0, window_bounds = array<i64: 8, 128>}, {transform_indices = @transform_1, window_bounds = array<i64: 128, 128>}, {transform_indices = @transform_2, window_bounds = array<i64: 1, 128>}, {transform_indices = @transform_3, window_bounds = array<i64: 8, 128>}]} {
    %c0_i32 = arith.constant 0 : i32
    %0 = arith.cmpi eq, %arg2, %c0_i32 : i32
    %1 = arith.extui %0 : i1 to i32
    %c0_i32_0 = arith.constant 0 : i32
    %2 = arith.cmpi ne, %1, %c0_i32_0 : i32
    scf.if %2 {
      %cst_10 = arith.constant 0.000000e+00 : f32
      %12 = vector.broadcast %cst_10 : f32 to vector<8x128xf32>
      %c0_11 = arith.constant 0 : index
      %c0_12 = arith.constant 0 : index
      %13 = vector.load %arg7[%c0_11, %c0_12] : memref<8x128xf32, #tpu.memory_space<vmem>>, vector<8x128xf32>
      tpu.vector_store %arg7[%c0_11, %c0_12], %12 {strides = array<i32>} : memref<8x128xf32, #tpu.memory_space<vmem>>, vector<8x128xf32>,
    } else {
    }
    %c0 = arith.constant 0 : index
    %c0_1 = arith.constant 0 : index
    %3 = vector.load %arg7[%c0, %c0_1] : memref<8x128xf32, #tpu.memory_space<vmem>>, vector<8x128xf32>
    %c0_2 = arith.constant 0 : index
    %c0_3 = arith.constant 0 : index
    %4 = vector.load %arg3[%c0_2, %c0_3] : memref<8x128xbf16, #tpu.memory_space<vmem>>, vector<8x128xbf16>
    %c0_4 = arith.constant 0 : index
    %c0_5 = arith.constant 0 : index
    %5 = vector.load %arg4[%c0_4, %c0_5] : memref<128x128xbf16, #tpu.memory_space<vmem>>, vector<128x128xbf16>
    %cst = arith.constant dense<0.000000e+00> : vector<8x128xf32>
    %6 = tpu.matmul %4, %5, %cst {dimension_numbers = #tpu.dot_dimension_numbers<[1], [0], [0], [1], [0, 0, 1, 1], [], []>} : vector<8x128xbf16>, vector<128x128xbf16>, vector<8x128xf32> -> vector<8x128xf32>
    %7 = arith.addf %3, %6 : vector<8x128xf32>
    %c0_6 = arith.constant 0 : index
    %c0_7 = arith.constant 0 : index
    %8 = vector.load %arg7[%c0_6, %c0_7] : memref<8x128xf32, #tpu.memory_space<vmem>>, vector<8x128xf32>
    tpu.vector_store %arg7[%c0_6, %c0_7], %7 {strides = array<i32>} : memref<8x128xf32, #tpu.memory_space<vmem>>, vector<8x128xf32>,
    %c0_i32_8 = arith.constant 0 : i32
    %9 = arith.cmpi eq, %arg2, %c0_i32_8 : i32
    %10 = arith.extui %9 : i1 to i32
    %c0_i32_9 = arith.constant 0 : i32
    %11 = arith.cmpi ne, %10, %c0_i32_9 : i32
    scf.if %11 {
      %c0_10 = arith.constant 0 : index
      %c0_11 = arith.constant 0 : index
      %12 = vector.load %arg7[%c0_10, %c0_11] : memref<8x128xf32, #tpu.memory_space<vmem>>, vector<8x128xf32>
      %c0_12 = arith.constant 0 : index
      %c0_13 = arith.constant 0 : index
      %13 = vector.load %arg5[%c0_12, %c0_13] : memref<1x128xf32, #tpu.memory_space<vmem>>, vector<1x128xf32>
      %14 = vector.broadcast %13 : vector<1x128xf32> to vector<8x128xf32>
      %15 = arith.addf %12, %14 : vector<8x128xf32>
      %c0_14 = arith.constant 0 : index
      %c0_15 = arith.constant 0 : index
      %16 = vector.load %arg6[%c0_14, %c0_15] : memref<8x128xf32, #tpu.memory_space<vmem>>, vector<8x128xf32>
      tpu.vector_store %arg6[%c0_14, %c0_15], %15 {strides = array<i32>} : memref<8x128xf32, #tpu.memory_space<vmem>>, vector<8x128xf32>,
    } else {
    }
    return
  }
  func.func @transform_0(%arg0: i32, %arg1: i32, %arg2: i32) -> (i32, i32) {
    %c0_i32 = arith.constant 0 : i32
    return %arg0, %arg2 : i32, i32
  }
  func.func @transform_1(%arg0: i32, %arg1: i32, %arg2: i32) -> (i32, i32) {
    %c0_i32 = arith.constant 0 : i32
    return %arg2, %arg1 : i32, i32
  }
  func.func @transform_2(%arg0: i32, %arg1: i32, %arg2: i32) -> (i32, i32) {
    %c0_i32 = arith.constant 0 : i32
    %c0_i32_0 = arith.constant 0 : i32
    return %c0_i32, %arg1 : i32, i32
  }
  func.func @transform_3(%arg0: i32, %arg1: i32, %arg2: i32) -> (i32, i32) {
    %c0_i32 = arith.constant 0 : i32
    return %arg0, %arg1 : i32, i32
  }
}

</mosaic_0001>

<bundles_post_ra>
// kernel: net_forward.1
= control target key start
LH: loop header
LB: loop body
LE: loop exit
PB: predicated region body
PF: predicated region fallthrough
CT: control target
= control target key end

     0   :  { %v193_v0 = vmov 0.0   ;;  %vm194_vm0 = vmmov 0   ;;  %s248_s1 = inlined_call_operand.vmem [shape: bf16[128,128], index: 1, kind: input, shape index: {}]   ;;  %s249_s0 = inlined_call_operand.vmem [shape: bf16[8,128], index: 0, kind: input, shape index: {}]   ;;  %s250_s2 = inlined_call_operand.vmem [shape: f32[1,128], index: 2, kind: input, shape index: {}]   ;;  %s251_s3 = inlined_call_operand.vmem [shape: f32[8,128], index: 3, kind: output, shape index: {}]  }
   0x1   :  { %163 = vmatprep.subr.bf16.mxu0 %v193_v0  ;;  %v185_v1 = vld [vmem:[%s248_s1] sm:$0xff]   ;;  %179 = vmatprep.mubr.msk.bf16.mxu0 %vm194_vm0, %v193_v0  ;;  %v186_v2 = vld [vmem:[%s248_s1 + $0x8] sm:$0xff]   ;;  %v187_v3 = vld [vmem:[%s248_s1 + $0x10] sm:$0xff]  }
   0x2   :  { %164 = vmatpush3.bf16.msra.mxu0 %v185_v1  ;;  %v188_v4 = vld [vmem:[%s248_s1 + $0x18] sm:$0xff]   ;;  %v189_v5 = vld [vmem:[%s248_s1 + $0x20] sm:$0xff]   ;;  %v190_v6 = vld [vmem:[%s248_s1 + $0x28] sm:$0xff]  }
   0x3   :  { %165 = vmatprep.subr.bf16.mxu0 %v193_v0  ;;  %v191_v7 = vld [vmem:[%s248_s1 + $0x30] sm:$0xff]   ;;  %v192_v8 = vld [vmem:[%s248_s1 + $0x38] sm:$0xff]   ;;  %v21_v9 = vld [vmem:[%s249_s0] sm:$0xf] }
   0x4   :  { %v153_v10 = vld [vmem:[%s250_s2] ss:$0 sm:$0xff] }
   0x6   :  { %166 = vmatpush3.bf16.msra.mxu0 %v186_v2 }
   0x7   :  { %167 = vmatprep.subr.bf16.mxu0 %v193_v0 }
   0xa   :  { %168 = vmatpush3.bf16.msra.mxu0 %v187_v3 }
   0xb   :  { %169 = vmatprep.subr.bf16.mxu0 %v193_v0 }
   0xe   :  { %170 = vmatpush3.bf16.msra.mxu0 %v188_v4 }
   0xf   :  { %171 = vmatprep.subr.bf16.mxu0 %v193_v0 }
  0x12   :  { %172 = vmatpush3.bf16.msra.mxu0 %v189_v5 }
  0x13   :  { %173 = vmatprep.subr.bf16.mxu0 %v193_v0 }
  0x16   :  { %174 = vmatpush3.bf16.msra.mxu0 %v190_v6 }
  0x17   :  { %175 = vmatprep.subr.bf16.mxu0 %v193_v0 }
  0x1a   :  { %176 = vmatpush3.bf16.msra.mxu0 %v191_v7 }
  0x1b   :  { %177 = vmatprep.subr.bf16.mxu0 %v193_v0 }
  0x1e   :  { %178 = vmatpush3.bf16.msra.mxu0 %v192_v8 }
  0x21   :  { %180 = vmatmul.mubr.bf16.vlgmr.msra.gmra.mrb[0].mxu0 %v21_v9 }
  0xf4   :  { %v120_v11 = vpop.f32.mrb[0].mxu0 }
  0xf5   :  { %v139_v12 = vadd.f32 %v153_v10, %v120_v11  ;;  %v181_v13 = vpop.f32.mrb[1].mxu0 }
  0xf6   :  { %v123_v14 = vpop.f32.mrb[2].mxu0 }
  0xf7   :  { %140 = vst [vmem:[%s251_s3] sm:$0xff] %v139_v12  ;;  %v182_v15 = vpop.f32.mrb[3].mxu0 }

</bundles_post_ra>
